<compile_context>
chip_gen: v6e
topology: v6e:2x2x1
jax: 0.10.0
libtpu: 0.0.40
codegen_flags: <defaults>
</compile_context>

<pallas_src>
import functools

import jax
import jax.numpy as jnp
from jax import lax
from jax.experimental import pallas as pl
from jax.experimental.pallas import tpu as pltpu


# ----------------------------------------------------------------------------
# Kernels
# ----------------------------------------------------------------------------

def _bn_relu_kernel(x_ref, scale_ref, shift_ref, o_ref):
    """Standalone BN+ReLU — only used when the caller wants x_bn_relu."""
    x = x_ref[...].astype(jnp.float32)
    o_ref[...] = jnp.maximum(x * scale_ref[...] + shift_ref[...],
                             0.0).astype(o_ref.dtype)


def _fused_bn_conv3x3_kernel(*refs, H, W, Ho, Wo, TH, stride, dilation,
                             compute_dtype, has_residual):
    """BN+ReLU (on the input) + 3x3 dilated/strided conv (+ optional residual).

    Grid = (N, Ho // TH).  Refs:
      x_ref     : (1, H, W, Cin)     whole image, resident across the h axis
      scale_ref : (1, Cin)           folded BN scale
      shift_ref : (1, Cin)           folded BN shift
      w_ref     : (9*Cin, Cout)      HWIO weights flattened tap-major
      res_ref   : (1, TH, Wo, Cout)  [only if has_residual]
      o_ref     : (1, TH, Wo, Cout)
      xp_ref    : VMEM (H+2d, W+2d, Cin) scratch — BN+ReLU'd, zero-padded
                  image, built once per image at h == 0 and reused by all
                  H tiles (halo never goes through HBM).
    """
    if has_residual:
        x_ref, scale_ref, shift_ref, w_ref, res_ref, o_ref, xp_ref = refs
    else:
        x_ref, scale_ref, shift_ref, w_ref, o_ref, xp_ref = refs
        res_ref = None

    d = dilation
    s = stride
    h = pl.program_id(1)
    Cin = x_ref.shape[3]
    Cout = w_ref.shape[1]

    @pl.when(h == 0)
    def _init():
        # In-VMEM halo: zero-fill then write the BN+ReLU'd interior.
        xp_ref[...] = jnp.zeros_like(xp_ref)
        xv = x_ref[0].astype(jnp.float32)
        xv = jnp.maximum(xv * scale_ref[...] + shift_ref[...], 0.0)
        xp_ref[d:d + H, d:d + W, :] = xv.astype(xp_ref.dtype)

    # Rows of the padded image needed by this output H tile.
    slab_rows = (TH - 1) * s + 2 * d + 1
    r0 = pl.multiple_of(h * (TH * s), TH * s)
    slab = xp_ref[pl.ds(r0, slab_rows), :, :]          # (slab_rows, W+2d, Cin)

    # im2col: collapse the 9 taps into the contraction dim -> one MXU matmul
    # with K = 9*Cin instead of nine K = Cin matmuls (small-Cin friendly).
    # Strided slicing computes only the needed output positions in-kernel.
    # TODO(synk): for large Cin switch back to 9 accumulated matmuls reading
    # taps directly from xp_ref (avoids the concat copies).
    taps = []
    for kh in range(3):
        for kw in range(3):
            taps.append(slab[kh * d:kh * d + (TH - 1) * s + 1:s,
                             kw * d:kw * d + (Wo - 1) * s + 1:s, :])
    patch = jnp.concatenate(taps, axis=-1).reshape(TH * Wo, 9 * Cin)

    acc = jnp.dot(patch.astype(compute_dtype),
                  w_ref[...].astype(compute_dtype),
                  preferred_element_type=jnp.float32)   # (TH*Wo, Cout) f32 acc
    out = acc.reshape(1, TH, Wo, Cout)
    if res_ref is not None:                             # fused residual add
        out = out + res_ref[...].astype(jnp.float32)
    o_ref[...] = out.astype(o_ref.dtype)


def _fused_bn_conv1x1_kernel(x_ref, scale_ref, shift_ref, w_ref, o_ref, *,
                             stride, Ho, Wo, compute_dtype):
    """BN+ReLU + 1x1 conv with in-kernel striding (computes only Ho x Wo)."""
    Cin = x_ref.shape[3]
    Cout = w_ref.shape[1]
    x = x_ref[0].astype(jnp.float32)
    x = jnp.maximum(x * scale_ref[...] + shift_ref[...], 0.0)
    if stride > 1:
        x = x[:(Ho - 1) * stride + 1:stride, :(Wo - 1) * stride + 1:stride, :]
    y = jnp.dot(x.reshape(Ho * Wo, Cin).astype(compute_dtype),
                w_ref[...].astype(compute_dtype),
                preferred_element_type=jnp.float32)
    o_ref[...] = y.reshape(1, Ho, Wo, Cout).astype(o_ref.dtype)


# ----------------------------------------------------------------------------
# Wrappers
# ----------------------------------------------------------------------------

def _bn_scale_shift(gamma, beta, mean, var, eps=1e-5):
    """Fold inference-mode BN into a per-channel scale/shift (shape (1, C))."""
    inv = gamma / jnp.sqrt(var + eps)
    scale = inv.reshape(1, -1).astype(jnp.float32)
    shift = (beta - mean * inv).reshape(1, -1).astype(jnp.float32)
    return scale, shift


def bn_relu(x, scale, shift, *, h_tile=8):
    N, H, W, C = x.shape
    TH = h_tile if (h_tile and H % h_tile == 0) else H
    return pl.pallas_call(
        _bn_relu_kernel,
        out_shape=jax.ShapeDtypeStruct((N, H, W, C), x.dtype),
        grid=(N, H // TH),
        in_specs=[pl.BlockSpec((1, TH, W, C), lambda n, h: (n, h, 0, 0)),
                  pl.BlockSpec((1, C), lambda n, h: (0, 0)),
                  pl.BlockSpec((1, C), lambda n, h: (0, 0))],
        out_specs=pl.BlockSpec((1, TH, W, C), lambda n, h: (n, h, 0, 0)),
        compiler_params=pltpu.CompilerParams(
            dimension_semantics=("parallel", "parallel")),
    )(x, scale, shift)


def conv3x3_bn_relu(x, w, scale, shift, *, stride=1, dilation=1, residual=None,
                    h_tile=8, compute_dtype=jnp.float32, vmem_limit_bytes=None):
    """y = conv3x3(relu(x*scale + shift)) [+ residual]; padding=dilation, no bias.

    x: (N, H, W, Cin) NHWC; w: (3, 3, Cin, Cout) HWIO.
    """
    N, H, W, Cin = x.shape
    Cout = w.shape[3]
    d = dilation
    Ho = (H - 1) // stride + 1       # PyTorch output size with padding=dilation
    Wo = (W - 1) // stride + 1
    TH = h_tile if (h_tile and Ho % h_tile == 0) else Ho
    nh = Ho // TH
    w2 = w.reshape(9 * Cin, Cout)    # tap-major (kh, kw, cin) -> contraction K

    kern = functools.partial(
        _fused_bn_conv3x3_kernel, H=H, W=W, Ho=Ho, Wo=Wo, TH=TH, stride=stride,
        dilation=d, compute_dtype=compute_dtype,
        has_residual=residual is not None)

    in_specs = [pl.BlockSpec((1, H, W, Cin), lambda n, h: (n, 0, 0, 0)),
                pl.BlockSpec((1, Cin), lambda n, h: (0, 0)),
                pl.BlockSpec((1, Cin), lambda n, h: (0, 0)),
                pl.BlockSpec((9 * Cin, Cout), lambda n, h: (0, 0))]
    args = [x, scale, shift, w2]
    if residual is not None:
        in_specs.append(pl.BlockSpec((1, TH, Wo, Cout),
                                     lambda n, h: (n, h, 0, 0)))
        args.append(residual)

    # NOTE: real resnet38d layers have Cout as a multiple of 128 -> lane-dense
    # stores; the tiny demo Cout is unavoidably masked.
    # TODO(synk): for large-channel tails (Cin/Cout >= 1024) add a Cout grid
    # axis (weight/output tiling) and manual halo DMA so weight slabs fit
    # v7x's 64 MiB VMEM; at demo/mid-network sizes whole weights fit easily.
    return pl.pallas_call(
        kern,
        out_shape=jax.ShapeDtypeStruct((N, Ho, Wo, Cout), x.dtype),
        grid=(N, nh),
        in_specs=in_specs,
        out_specs=pl.BlockSpec((1, TH, Wo, Cout), lambda n, h: (n, h, 0, 0)),
        scratch_shapes=[pltpu.VMEM((H + 2 * d, W + 2 * d, Cin), compute_dtype)],
        # h axis is 'arbitrary' because the BN'd padded image is cached in
        # scratch across H tiles; the batch axis carries the megacore split.
        compiler_params=pltpu.CompilerParams(
            dimension_semantics=("parallel", "arbitrary"),
            vmem_limit_bytes=vmem_limit_bytes),
    )(*args)


def conv1x1_bn_relu(x, w, scale, shift, *, stride=1, compute_dtype=jnp.float32,
                    vmem_limit_bytes=None):
    """y = conv1x1(relu(x*scale + shift)) with stride, no bias.  w: (Cin, Cout)."""
    N, H, W, Cin = x.shape
    Cout = w.shape[1]
    Ho = (H - 1) // stride + 1
    Wo = (W - 1) // stride + 1
    kern = functools.partial(_fused_bn_conv1x1_kernel, stride=stride, Ho=Ho,
                             Wo=Wo, compute_dtype=compute_dtype)
    return pl.pallas_call(
        kern,
        out_shape=jax.ShapeDtypeStruct((N, Ho, Wo, Cout), x.dtype),
        grid=(N,),
        in_specs=[pl.BlockSpec((1, H, W, Cin), lambda n: (n, 0, 0, 0)),
                  pl.BlockSpec((1, Cin), lambda n: (0, 0)),
                  pl.BlockSpec((1, Cin), lambda n: (0, 0)),
                  pl.BlockSpec((Cin, Cout), lambda n: (0, 0))],
        out_specs=pl.BlockSpec((1, Ho, Wo, Cout), lambda n: (n, 0, 0, 0)),
        compiler_params=pltpu.CompilerParams(
            dimension_semantics=("parallel",),
            vmem_limit_bytes=vmem_limit_bytes),
    )(x, scale, shift, w)


# ----------------------------------------------------------------------------
# ResBlock
# ----------------------------------------------------------------------------

def init_resblock_params(key, in_channels, mid_channels, out_channels,
                         stride=1):
    """Deterministic synthetic parameters (shapes match the PyTorch module)."""
    ks = jax.random.split(key, 8)
    same_shape = (in_channels == out_channels) and (stride == 1)

    def bn_params(k, c):
        k1, k2, k3, k4 = jax.random.split(k, 4)
        gamma = 1.0 + 0.1 * jax.random.normal(k1, (c,), jnp.float32)
        beta = 0.1 * jax.random.normal(k2, (c,), jnp.float32)
        mean = 0.1 * jax.random.normal(k3, (c,), jnp.float32)
        var = 0.5 + jnp.abs(jax.random.normal(k4, (c,), jnp.float32))
        return gamma, beta, mean, var

    p = {
        "bn2a": bn_params(ks[0], in_channels),
        # conv weights stored directly in HWIO (PyTorch OIHW -> HWIO transpose)
        "w2a": 0.1 * jax.random.normal(ks[1], (3, 3, in_channels, mid_channels),
                                       jnp.float32),
        "bn2b1": bn_params(ks[2], mid_channels),
        "w2b1": 0.1 * jax.random.normal(ks[3], (3, 3, mid_channels, out_channels),
                                        jnp.float32),
        "same_shape": same_shape,
    }
    if not same_shape:
        p["w1"] = 0.1 * jax.random.normal(ks[4], (in_channels, out_channels),
                                          jnp.float32)
    return p


def resblock_forward(x, params, *, stride=1, dilation=1, first_dilation=None,
                     get_x_bn_relu=False, h_tile=8, compute_dtype=jnp.float32,
                     vmem_limit_bytes=None):
    """x: (N, H, W, Cin) NHWC.  Matches ResBlock.forward semantics."""
    if first_dilation is None:
        first_dilation = dilation
    same_shape = params["same_shape"]

    g, b, m, v = params["bn2a"]
    scale_a, shift_a = _bn_scale_shift(g, b, m, v)

    # branch1 (projection or identity) — BN2a+ReLU fused into the 1x1 conv
    if not same_shape:
        branch1 = conv1x1_bn_relu(x, params["w1"], scale_a, shift_a,
                                  stride=stride, compute_dtype=compute_dtype,
                                  vmem_limit_bytes=vmem_limit_bytes)
    else:
        branch1 = x

    # branch2: BN2a+ReLU fused into conv2a (strided / first_dilation)
    branch2 = conv3x3_bn_relu(x, params["w2a"], scale_a, shift_a,
                              stride=stride, dilation=first_dilation,
                              h_tile=h_tile, compute_dtype=compute_dtype,
                              vmem_limit_bytes=vmem_limit_bytes)

    # BN2b1+ReLU fused into conv2b1, residual add fused into its epilogue
    g, b, m, v = params["bn2b1"]
    scale_b, shift_b = _bn_scale_shift(g, b, m, v)
    out = conv3x3_bn_relu(branch2, params["w2b1"], scale_b, shift_b,
                          stride=1, dilation=dilation, residual=branch1,
                          h_tile=h_tile, compute_dtype=compute_dtype,
                          vmem_limit_bytes=vmem_limit_bytes)

    if get_x_bn_relu:
        # x_bn_relu is a real module output, so materialize it only when asked
        # for; the convs consumed the BN in-VMEM and never read this tensor.
        x_bn_relu = bn_relu(x, scale_a, shift_a, h_tile=h_tile)
        return out, x_bn_relu
    return out


# ----------------------------------------------------------------------------
# Pure-JAX reference (for verification)
# ----------------------------------------------------------------------------

def _ref_bn_relu(x, g, b, m, v, eps=1e-5):
    y = (x - m) / jnp.sqrt(v + eps) * g + b
    return jnp.maximum(y, 0.0)


def _ref_conv(x, w, stride, dil, pad):
    return lax.conv_general_dilated(
        x, w, window_strides=(stride, stride),
        padding=[(pad, pad), (pad, pad)], rhs_dilation=(dil, dil),
        dimension_numbers=("NHWC", "HWIO", "NHWC"))


def resblock_reference(x, params, *, stride=1, dilation=1, first_dilation=None):
    if first_dilation is None:
        first_dilation = dilation
    g, b, m, v = params["bn2a"]
    branch2 = _ref_bn_relu(x, g, b, m, v)
    if not params["same_shape"]:
        w1 = params["w1"].reshape(1, 1, *params["w1"].shape)
        branch1 = _ref_conv(branch2, w1, stride, 1, 0)   # 1x1 conv: padding=0
    else:
        branch1 = x
    branch2 = _ref_conv(branch2, params["w2a"], stride, first_dilation,
                        first_dilation)
    g, b, m, v = params["bn2b1"]
    branch2 = _ref_bn_relu(branch2, g, b, m, v)
    branch2 = _ref_conv(branch2, params["w2b1"], 1, dilation, dilation)
    return branch1 + branch2


# ----------------------------------------------------------------------------
# Demo
# ----------------------------------------------------------------------------

if __name__ == "__main__":
    key = jax.random.PRNGKey(0)
    kx, kp, kx2, kp2 = jax.random.split(key, 4)

    # config 1: projection block (same_shape=False), stride=1, dilation=1
    # NHWC input; NCHW-equivalent shape: (2, 4, 16, 16)
    N, Cin, Cmid, Cout, H, W = 2, 4, 4, 8, 16, 16
    x = jax.random.normal(kx, (N, H, W, Cin), jnp.float32)
    params = init_resblock_params(kp, Cin, Cmid, Cout, stride=1)

    out, x_bn_relu = resblock_forward(x, params, stride=1, dilation=1,
                                      get_x_bn_relu=True)
    out = jax.block_until_ready(out)
    x_bn_relu = jax.block_until_ready(x_bn_relu)

    ref = resblock_reference(x, params, stride=1, dilation=1)
    g, b, m, v = params["bn2a"]
    ref_xbn = _ref_bn_relu(x, g, b, m, v)
    assert out.shape == (N, H, W, Cout)
    assert x_bn_relu.shape == (N, H, W, Cin)
    assert jnp.allclose(out, ref, rtol=1e-4, atol=1e-4), "config1: out mismatch"
    assert jnp.allclose(x_bn_relu, ref_xbn, rtol=1e-4, atol=1e-4), \
        "config1: x_bn_relu mismatch"

    # config 2: identity block (same_shape=True), mixed dilation
    C2 = 8
    x2 = jax.random.normal(kx2, (N, H, W, C2), jnp.float32)
    params2 = init_resblock_params(kp2, C2, C2, C2, stride=1)
    out2 = jax.block_until_ready(
        resblock_forward(x2, params2, stride=1, dilation=2, first_dilation=1))
    ref2 = resblock_reference(x2, params2, stride=1, dilation=2,
                              first_dilation=1)
    assert jnp.allclose(out2, ref2, rtol=1e-4, atol=1e-4), "config2: out mismatch"

    print("KERNEL_OK")
</pallas_src>

<mosaic_0001>
module attributes {stable_mosaic.version = 11 : i64} {
  func.func @_fused_bn_conv1x1_kernel(%arg0: i32, %arg1: memref<1x16x16x4xf32, #tpu.memory_space<vmem>>, %arg2: memref<1x4xf32, #tpu.memory_space<vmem>>, %arg3: memref<1x4xf32, #tpu.memory_space<vmem>>, %arg4: memref<4x8xf32, #tpu.memory_space<vmem>>, %arg5: memref<1x16x16x8xf32, #tpu.memory_space<vmem>>) attributes {dimension_semantics = [#tpu.dimension_semantics<parallel>], iteration_bounds = array<i64: 2>, scalar_prefetch = 0 : i64, scratch_operands = 0 : i64, tpu.core_type = #tpu.core_type<tc>, window_params = [{transform_indices = @transform_0, window_bounds = array<i64: 1, 16, 16, 4>}, {pipeline_mode = #tpu.pipeline_mode<synchronous>, transform_indices = @transform_1, window_bounds = array<i64: 1, 4>}, {pipeline_mode = #tpu.pipeline_mode<synchronous>, transform_indices = @transform_2, window_bounds = array<i64: 1, 4>}, {pipeline_mode = #tpu.pipeline_mode<synchronous>, transform_indices = @transform_3, window_bounds = array<i64: 4, 8>}, {transform_indices = @transform_4, window_bounds = array<i64: 1, 16, 16, 8>}]} {
    %c0 = arith.constant 0 : index
    %c0_0 = arith.constant 0 : index
    %c0_1 = arith.constant 0 : index
    %c0_2 = arith.constant 0 : index
    %0 = vector.load %arg1[%c0, %c0_0, %c0_1, %c0_2] : memref<1x16x16x4xf32, #tpu.memory_space<vmem>>, vector<1x16x16x4xf32>
    %1 = vector.shape_cast %0 : vector<1x16x16x4xf32> to vector<16x16x4xf32>
    %c0_3 = arith.constant 0 : index
    %c0_4 = arith.constant 0 : index
    %2 = vector.load %arg2[%c0_3, %c0_4] : memref<1x4xf32, #tpu.memory_space<vmem>>, vector<1x4xf32>
    %3 = vector.shape_cast %2 : vector<1x4xf32> to vector<1x1x4xf32>
    %4 = vector.broadcast %3 : vector<1x1x4xf32> to vector<16x16x4xf32>
    %5 = arith.mulf %1, %4 : vector<16x16x4xf32>
    %c0_5 = arith.constant 0 : index
    %c0_6 = arith.constant 0 : index
    %6 = vector.load %arg3[%c0_5, %c0_6] : memref<1x4xf32, #tpu.memory_space<vmem>>, vector<1x4xf32>
    %7 = vector.shape_cast %6 : vector<1x4xf32> to vector<1x1x4xf32>
    %8 = vector.broadcast %7 : vector<1x1x4xf32> to vector<16x16x4xf32>
    %9 = arith.addf %5, %8 : vector<16x16x4xf32>
    %cst = arith.constant 0.000000e+00 : f32
    %10 = vector.broadcast %cst : f32 to vector<16x16x4xf32>
    %11 = arith.maximumf %9, %10 : vector<16x16x4xf32>
    %12 = vector.shape_cast %11 : vector<16x16x4xf32> to vector<256x4xf32>
    %c0_7 = arith.constant 0 : index
    %c0_8 = arith.constant 0 : index
    %13 = vector.load %arg4[%c0_7, %c0_8] : memref<4x8xf32, #tpu.memory_space<vmem>>, vector<4x8xf32>
    %cst_9 = arith.constant dense<0.000000e+00> : vector<256x8xf32>
    %14 = tpu.matmul %12, %13, %cst_9 {dimension_numbers = #tpu.dot_dimension_numbers<[1], [0], [0], [1], [0, 0, 1, 1], [], []>} : vector<256x4xf32>, vector<4x8xf32>, vector<256x8xf32> -> vector<256x8xf32>
    %15 = vector.shape_cast %14 : vector<256x8xf32> to vector<1x16x16x8xf32>
    %c0_10 = arith.constant 0 : index
    %c0_11 = arith.constant 0 : index
    %c0_12 = arith.constant 0 : index
    %c0_13 = arith.constant 0 : index
    %16 = vector.load %arg5[%c0_10, %c0_11, %c0_12, %c0_13] : memref<1x16x16x8xf32, #tpu.memory_space<vmem>>, vector<1x16x16x8xf32>
    tpu.vector_store %arg5[%c0_10, %c0_11, %c0_12, %c0_13], %15 {strides = array<i32>} : memref<1x16x16x8xf32, #tpu.memory_space<vmem>>, vector<1x16x16x8xf32>,
    return
  }
  func.func @transform_0(%arg0: i32) -> (i32, i32, i32, i32) {
    %c0_i32 = arith.constant 0 : i32
    %c0_i32_0 = arith.constant 0 : i32
    %c0_i32_1 = arith.constant 0 : i32
    %c0_i32_2 = arith.constant 0 : i32
    return %arg0, %c0_i32, %c0_i32_0, %c0_i32_1 : i32, i32, i32, i32
  }
  func.func @transform_1(%arg0: i32) -> (i32, i32) {
    %c0_i32 = arith.constant 0 : i32
    %c0_i32_0 = arith.constant 0 : i32
    %c0_i32_1 = arith.constant 0 : i32
    return %c0_i32, %c0_i32_0 : i32, i32
  }
  func.func @transform_2(%arg0: i32) -> (i32, i32) {
    %c0_i32 = arith.constant 0 : i32
    %c0_i32_0 = arith.constant 0 : i32
    %c0_i32_1 = arith.constant 0 : i32
    return %c0_i32, %c0_i32_0 : i32, i32
  }
  func.func @transform_3(%arg0: i32) -> (i32, i32) {
    %c0_i32 = arith.constant 0 : i32
    %c0_i32_0 = arith.constant 0 : i32
    %c0_i32_1 = arith.constant 0 : i32
    return %c0_i32, %c0_i32_0 : i32, i32
  }
  func.func @transform_4(%arg0: i32) -> (i32, i32, i32, i32) {
    %c0_i32 = arith.constant 0 : i32
    %c0_i32_0 = arith.constant 0 : i32
    %c0_i32_1 = arith.constant 0 : i32
    %c0_i32_2 = arith.constant 0 : i32
    return %arg0, %c0_i32, %c0_i32_0, %c0_i32_1 : i32, i32, i32, i32
  }
}

</mosaic_0001>

<bundles_post_ra>
// kernel: tpu_custom_call.1
= control target key start
LH: loop header
LB: loop body
LE: loop exit
PB: predicated region body
PF: predicated region fallthrough
CT: control target
= control target key end

     0   :  { %s929_s15 = smov 0   ;;  %s1162_s0 = inlined_call_operand.vmem [shape: f32[2,16,16,4], index: 0, kind: input, shape index: {}]   ;;  %s1163_s1 = inlined_call_operand.vmem [shape: f32[1,4], index: 1, kind: input, shape index: {}]   ;;  %s1164_s2 = inlined_call_operand.vmem [shape: f32[1,4], index: 2, kind: input, shape index: {}]   ;;  %s1165_s3 = inlined_call_operand.vmem [shape: f32[4,8], index: 3, kind: input, shape index: {}]   ;;  %s1166_s4 = inlined_call_operand.vmem [shape: f32[2,16,16,8], index: 4, kind: output, shape index: {}]  }
   0x1 LB: > { %s755_s16 = sadd.s32 4294967295, %s902_s15   ;;  %p759_p0 = scmp.ge.s32.totalorder %s902_s15, 1  ;;  %s902_s15 = sphi %s929_s15, %s14_s15  }
   0x2   : > { %p162_p1 = scmp.lt.s32.totalorder %s902_s15, 3 }
   0x4   : > { %p163_p2 = pnand %p759_p0, %p162_p1 }
   0x5   : > { %p188_p3 = scmp.lt.s32.totalorder (!%p163_p2), %s755_s16, 1 }
   0x6   : > { %166 = sbr.rel (%p163_p2) target bundleno = 247 (0xf7), region = 36 }
   0xb   : > { %v340_v0 = vld [vmem:[%s1165_s3] sm:$0xf]  ;;  %vm438_vm0 = vcmask 1043456   ;;  %s1168_s16 = smov (!%p188_p3, %s755_s16), 1  ;;  %vm341_vm1 = vcmask 31744   ;;  %vm667_vm2 = vcmask 64512  }
   0xc   : > { %836 = vmatprep.subr.msk.mxu0 %vm438_vm0, %v340_v0  ;;  %886 = vmatprep.subr.msk.mxu1 %vm438_vm0, %v340_v0  ;;  %s801_s19 = sshll.u32 %s1168_s16, 8  ;;  %v946_v1 = vld [vmem:[%s1163_s1] ss:$0 sm:$0xff] }
   0xd   : > { %837 = vmatpush3.msk.msra.mxu0 %vm438_vm0, %v340_v0  ;;  %887 = vmatpush3.msk.msra.mxu1 %vm438_vm0, %v340_v0  ;;  %s953_s24 = scalar_lea.vmem %s1162_s0, %s801_s19  ;;  %v958_v2 = vld [vmem:[%s1164_s2] ss:$0 sm:$0xff]  ;;  %s1093_s29 = scalar_lea.vmem %s1166_s4, %s801_s19 }
   0xe   : > { %v198_v3 = vld [vmem:[%s953_s24] sm:$0xff]  ;;  %v199_v5 = vld [vmem:[%s953_s24 + $0x8] sm:$0xff]  ;;  %v200_v10 = vld [vmem:[%s953_s24 + $0x10] sm:$0xff] }
   0xf   : > { %v214_v4 = vld [vmem:[%s953_s24 + $0x80] sm:$0xff]  ;;  %v237_v6 = vmul.f32 %v946_v1, %v198_v3  ;;  %v238_v8 = vmul.f32 %v946_v1, %v199_v5  ;;  %v215_v9 = vld [vmem:[%s953_s24 + $0x88] sm:$0xff]  ;;  %v216_v11 = vld [vmem:[%s953_s24 + $0x90] sm:$0xff]  ;;  %v239_v13 = vmul.f32 %v946_v1, %v200_v10 }
  0x10   : > { %v253_v7 = vmul.f32 %v946_v1, %v214_v4  ;;  %v254_v12 = vmul.f32 %v946_v1, %v215_v9  ;;  %v255_v14 = vmul.f32 %v946_v1, %v216_v11  ;;  %v201_v15 = vld [vmem:[%s953_s24 + $0x18] sm:$0xff]  ;;  %v202_v25 = vld [vmem:[%s953_s24 + $0x20] sm:$0xff]  ;;  %v203_v27 = vld [vmem:[%s953_s24 + $0x28] sm:$0xff] }
  0x11   : > { %v217_v16 = vld [vmem:[%s953_s24 + $0x98] sm:$0xff]  ;;  %v276_v17 = vadd.f32 %v958_v2, %v237_v6  ;;  %v277_v19 = vadd.f32 %v958_v2, %v238_v8  ;;  %v240_v20 = vmul.f32 %v946_v1, %v201_v15  ;;  %v278_v22 = vadd.f32 %v958_v2, %v239_v13  ;;  %v218_v26 = vld [vmem:[%s953_s24 + $0xa0] sm:$0xff]  ;;  %v219_v32 = vld [vmem:[%s953_s24 + $0xa8] sm:$0xff] }
  0x12   : > { %v292_v18 = vadd.f32 %v958_v2, %v253_v7  ;;  %v293_v21 = vadd.f32 %v958_v2, %v254_v12  ;;  %v294_v23 = vadd.f32 %v958_v2, %v255_v14  ;;  %v256_v24 = vmul.f32 %v946_v1, %v217_v16  ;;  %v204_v33 = vld [vmem:[%s953_s24 + $0x30] sm:$0xff]  ;;  %v205_v43 = vld [vmem:[%s953_s24 + $0x38] sm:$0xff]  ;;  %v206_v56 = vld [vmem:[%s953_s24 + $0x40] sm:$0xff] }
  0x13   : > { %v308_v28 = vmax.f32 %v276_v17, 0.0  ;;  %v309_v30 = vmax.f32 %v277_v19, 0.0  ;;  %v279_v31 = vadd.f32 %v958_v2, %v240_v20  ;;  %v220_v34 = vld [vmem:[%s953_s24 + $0xb0] sm:$0xff]  ;;  %v310_v36 = vmax.f32 %v278_v22, 0.0  ;;  %v221_v48 = vld [vmem:[%s953_s24 + $0xb8] sm:$0xff]  ;;  %v222_v57 = vld [vmem:[%s953_s24 + $0xc0] sm:$0xff] }
  0x14   : > { %v324_v29 = vmax.f32 %v292_v18, 0.0  ;;  %v325_v35 = vmax.f32 %v293_v21, 0.0  ;;  %v326_v37 = vmax.f32 %v294_v23, 0.0  ;;  %v295_v38 = vadd.f32 %v958_v2, %v256_v24  ;;  %v207_v61 = vld [vmem:[%s953_s24 + $0x48] sm:$0xff]  ;;  %v208_v63 = vld [vmem:[%s953_s24 + $0x50] sm:$0xff]  ;;  %v209_v14 = vld [vmem:[%s953_s24 + $0x58] sm:$0xff] }
  0x15   : > { %838 = vmatprep.mubr.msk.f32.mxu0 %vm341_vm1, %v308_v28  ;;  %v311_v39 = vmax.f32 %v279_v31, 0.0  ;;  %v241_v40 = vmul.f32 %v946_v1, %v202_v25  ;;  %v257_v41 = vmul.f32 %v946_v1, %v218_v26  ;;  %v242_v42 = vmul.f32 %v946_v1, %v203_v27  ;;  %v223_v62 = vld [vmem:[%s953_s24 + $0xc8] sm:$0xff]  ;;  %v224_v6 = vld [vmem:[%s953_s24 + $0xd0] sm:$0xff]  ;;  %v225_v19 = vld [vmem:[%s953_s24 + $0xd8] sm:$0xff] }
  0x16   : > { %862 = vmatprep.mubr.msk.f32.mxu1 %vm341_vm1, %v324_v29  ;;  %839 = vmatmul.mubr.msk.f32.vlgmr.msra.gmra.mxu0 %vm341_vm1, %v309_v30  ;;  %v327_v44 = vmax.f32 %v295_v38, 0.0  ;;  %v258_v45 = vmul.f32 %v946_v1, %v219_v32  ;;  %v243_v46 = vmul.f32 %v946_v1, %v204_v33  ;;  %v259_v47 = vmul.f32 %v946_v1, %v220_v34  ;;  %v210_v24 = vld [vmem:[%s953_s24 + $0x60] sm:$0xff]  ;;  %v211_v30 = vld [vmem:[%s953_s24 + $0x68] sm:$0xff]  ;;  %v212_v34 = vld [vmem:[%s953_s24 + $0x70] sm:$0xff] }
  0x17   : > { %863 = vmatmul.mubr.msk.f32.vlgmr.msra.gmra.mxu1 %vm341_vm1, %v325_v35  ;;  %841 = vmatprep.mubr.msk.f32.mxu0 %vm341_vm1, %v310_v36  ;;  %v280_v49 = vadd.f32 %v958_v2, %v241_v40  ;;  %v296_v50 = vadd.f32 %v958_v2, %v257_v41  ;;  %v281_v51 = vadd.f32 %v958_v2, %v242_v42  ;;  %v226_v25 = vld [vmem:[%s953_s24 + $0xe0] sm:$0xff]  ;;  %v227_v31 = vld [vmem:[%s953_s24 + $0xe8] sm:$0xff] }
  0x18   : > { %865 = vmatprep.mubr.msk.f32.mxu1 %vm341_vm1, %v326_v37  ;;  %v297_v52 = vadd.f32 %v958_v2, %v258_v45  ;;  %v282_v53 = vadd.f32 %v958_v2, %v243_v46  ;;  %v298_v54 = vadd.f32 %v958_v2, %v259_v47  ;;  %v244_v55 = vmul.f32 %v946_v1, %v205_v43 }
  0x19   : > { %v312_v58 = vmax.f32 %v280_v49, 0.0  ;;  %v328_v59 = vmax.f32 %v296_v50, 0.0  ;;  %v260_v60 = vmul.f32 %v946_v1, %v221_v48  ;;  %v313_v0 = vmax.f32 %v281_v51, 0.0  ;;  %v213_v48 = vld [vmem:[%s953_s24 + $0x78] sm:$0xff] }
  0x1a   : > { %842 = vmatmul.mubr.msk.f32.gmra.mxu0 %vm341_vm1, %v311_v39  ;;  %v329_v3 = vmax.f32 %v297_v52, 0.0  ;;  %v314_v4 = vmax.f32 %v282_v53, 0.0  ;;  %v283_v5 = vadd.f32 %v958_v2, %v244_v55  ;;  %v330_v7 = vmax.f32 %v298_v54, 0.0  ;;  %v228_v39 = vld [vmem:[%s953_s24 + $0xf0] sm:$0xff]  ;;  %v229_v49 = vld [vmem:[%s953_s24 + $0xf8] sm:$0xff] }
  0x1b   : > { %866 = vmatmul.mubr.msk.f32.gmra.mxu1 %vm341_vm1, %v327_v44  ;;  %844 = vmatprep.mubr.msk.f32.mxu0 %vm341_vm1, %v312_v58  ;;  %v299_v8 = vadd.f32 %v958_v2, %v260_v60  ;;  %v245_v9 = vmul.f32 %v946_v1, %v206_v56  ;;  %v261_v10 = vmul.f32 %v946_v1, %v222_v57 }
  0x1c   : > { %868 = vmatprep.mubr.msk.f32.mxu1 %vm341_vm1, %v328_v59  ;;  %v246_v11 = vmul.f32 %v946_v1, %v207_v61  ;;  %v262_v12 = vmul.f32 %v946_v1, %v223_v62  ;;  %v247_v13 = vmul.f32 %v946_v1, %v208_v63  ;;  %v315_v15 = vmax.f32 %v283_v5, 0.0 }
  0x1d   : > { %v284_v16 = vadd.f32 %v958_v2, %v245_v9  ;;  %v300_v17 = vadd.f32 %v958_v2, %v261_v10  ;;  %v263_v18 = vmul.f32 %v946_v1, %v224_v6  ;;  %v331_v20 = vmax.f32 %v299_v8, 0.0 }
  0x1e   : > { %845 = vmatmul.mubr.msk.f32.gmra.mxu0 %vm341_vm1, %v313_v0  ;;  %v285_v21 = vadd.f32 %v958_v2, %v246_v11  ;;  %v301_v22 = vadd.f32 %v958_v2, %v262_v12  ;;  %v286_v23 = vadd.f32 %v958_v2, %v247_v13  ;;  %v248_v29 = vmul.f32 %v946_v1, %v209_v14 }
  0x1f   : > { %869 = vmatmul.mubr.msk.f32.gmra.mxu1 %vm341_vm1, %v329_v3  ;;  %847 = vmatprep.mubr.msk.f32.mxu0 %vm341_vm1, %v314_v4  ;;  %v316_v26 = vmax.f32 %v284_v16, 0.0  ;;  %v332_v27 = vmax.f32 %v300_v17, 0.0  ;;  %v302_v28 = vadd.f32 %v958_v2, %v263_v18  ;;  %v264_v33 = vmul.f32 %v946_v1, %v225_v19 }
  0x20   : > { %871 = vmatprep.mubr.msk.f32.mxu1 %vm341_vm1, %v330_v7  ;;  %v317_v32 = vmax.f32 %v285_v21, 0.0  ;;  %v333_v35 = vmax.f32 %v301_v22, 0.0  ;;  %v287_v36 = vadd.f32 %v958_v2, %v248_v29  ;;  %v249_v37 = vmul.f32 %v946_v1, %v210_v24 }
  0x21   : > { %v265_v38 = vmul.f32 %v946_v1, %v226_v25  ;;  %v318_v40 = vmax.f32 %v286_v23, 0.0  ;;  %v303_v41 = vadd.f32 %v958_v2, %v264_v33  ;;  %v250_v42 = vmul.f32 %v946_v1, %v211_v30 }
  0x22   : > { %848 = vmatmul.mubr.msk.f32.gmra.mxu0 %vm341_vm1, %v315_v15  ;;  %v266_v43 = vmul.f32 %v946_v1, %v227_v31  ;;  %v334_v44 = vmax.f32 %v302_v28, 0.0  ;;  %v288_v45 = vadd.f32 %v958_v2, %v249_v37  ;;  %v251_v47 = vmul.f32 %v946_v1, %v212_v34 }
  0x23   : > { %872 = vmatmul.mubr.msk.f32.gmra.mxu1 %vm341_vm1, %v331_v20  ;;  %850 = vmatprep.mubr.msk.f32.mxu0 %vm341_vm1, %v316_v26  ;;  %v304_v46 = vadd.f32 %v958_v2, %v265_v38  ;;  %v267_v50 = vmul.f32 %v946_v1, %v228_v39  ;;  %v319_v51 = vmax.f32 %v287_v36, 0.0  ;;  %v289_v52 = vadd.f32 %v958_v2, %v250_v42 }
  0x24   : > { %874 = vmatprep.mubr.msk.f32.mxu1 %vm341_vm1, %v332_v27  ;;  %v335_v53 = vmax.f32 %v303_v41, 0.0  ;;  %v305_v54 = vadd.f32 %v958_v2, %v266_v43  ;;  %v252_v55 = vmul.f32 %v946_v1, %v213_v48  ;;  %v268_v56 = vmul.f32 %v946_v1, %v229_v49 }
  0x25   : > { %v320_v57 = vmax.f32 %v288_v45, 0.0  ;;  %v336_v58 = vmax.f32 %v304_v46, 0.0  ;;  %v290_v59 = vadd.f32 %v958_v2, %v251_v47  ;;  %v306_v60 = vadd.f32 %v958_v2, %v267_v50 }
  0x26   : > { %851 = vmatmul.mubr.msk.f32.gmra.mxu0 %vm341_vm1, %v317_v32  ;;  %v321_v61 = vmax.f32 %v289_v52, 0.0  ;;  %v337_v62 = vmax.f32 %v305_v54, 0.0  ;;  %v291_v63 = vadd.f32 %v958_v2, %v252_v55  ;;  %v307_v1 = vadd.f32 %v958_v2, %v268_v56 }
  0x27   : > { %875 = vmatmul.mubr.msk.f32.gmra.mxu1 %vm341_vm1, %v333_v35  ;;  %853 = vmatprep.mubr.msk.f32.mxu0 %vm341_vm1, %v318_v40  ;;  %v322_v0 = vmax.f32 %v290_v59, 0.0  ;;  %v338_v3 = vmax.f32 %v306_v60, 0.0 }
  0x28   : > { %877 = vmatprep.mubr.msk.f32.mxu1 %vm341_vm1, %v334_v44  ;;  %v323_v4 = vmax.f32 %v291_v63, 0.0  ;;  %v339_v5 = vmax.f32 %v307_v1, 0.0 }
  0x2a   : > { %854 = vmatmul.mubr.msk.f32.gmra.mxu0 %vm341_vm1, %v319_v51 }
  0x2b   : > { %878 = vmatmul.mubr.msk.f32.gmra.mxu1 %vm341_vm1, %v335_v53  ;;  %856 = vmatprep.mubr.msk.f32.mxu0 %vm341_vm1, %v320_v57 }
  0x2c   : > { %880 = vmatprep.mubr.msk.f32.mxu1 %vm341_vm1, %v336_v58 }
  0x2e   : > { %857 = vmatmul.mubr.msk.f32.gmra.mxu0 %vm341_vm1, %v321_v61 }
  0x2f   : > { %881 = vmatmul.mubr.msk.f32.gmra.mxu1 %vm341_vm1, %v337_v62  ;;  %859 = vmatprep.mubr.msk.f32.mxu0 %vm341_vm1, %v322_v0 }
  0x30   : > { %883 = vmatprep.mubr.msk.f32.mxu1 %vm341_vm1, %v338_v3 }
  0x32   : > { %860 = vmatmul.mubr.msk.f32.gmra.mxu0 %vm341_vm1, %v323_v4 }
  0x33   : > { %884 = vmatmul.mubr.msk.f32.gmra.mxu1 %vm341_vm1, %v339_v5 }
  0xd6   : > { %v840_v2 = vpop.f32.mrf.mxu0 }
  0xd7   : > { %v864_v6 = vpop.f32.mrf.mxu1  ;;  %669 = vst.msk [vmem:[%s1093_s29 + $0x8] sm:$0xff] %vm667_vm2, %v840_v2 }
  0xd8   : > { %685 = vst.msk [vmem:[%s1093_s29 + $0x88] sm:$0xff] %vm667_vm2, %v864_v6  ;;  %v508_v7 = vpop.f32.mrf.mxu0 }
  0xd9   : > { %v588_v8 = vpop.f32.mrf.mxu1  ;;  %668 = vst.msk [vmem:[%s1093_s29] sm:$0xff] %vm667_vm2, %v508_v7 }
  0xda   : > { %684 = vst.msk [vmem:[%s1093_s29 + $0x80] sm:$0xff] %vm667_vm2, %v588_v8  ;;  %v843_v9 = vpop.f32.mrf.mxu0 }
  0xdb   : > { %v867_v10 = vpop.f32.mrf.mxu1  ;;  %671 = vst.msk [vmem:[%s1093_s29 + $0x18] sm:$0xff] %vm667_vm2, %v843_v9 }
  0xdc   : > { %687 = vst.msk [vmem:[%s1093_s29 + $0x98] sm:$0xff] %vm667_vm2, %v867_v10  ;;  %v518_v11 = vpop.f32.mrf.mxu0 }
  0xdd   : > { %v598_v12 = vpop.f32.mrf.mxu1  ;;  %670 = vst.msk [vmem:[%s1093_s29 + $0x10] sm:$0xff] %vm667_vm2, %v518_v11 }
  0xde   : > { %686 = vst.msk [vmem:[%s1093_s29 + $0x90] sm:$0xff] %vm667_vm2, %v598_v12  ;;  %v846_v13 = vpop.f32.mrf.mxu0 }
  0xdf   : > { %v870_v14 = vpop.f32.mrf.mxu1  ;;  %673 = vst.msk [vmem:[%s1093_s29 + $0x28] sm:$0xff] %vm667_vm2, %v846_v13 }
  0xe0   : > { %689 = vst.msk [vmem:[%s1093_s29 + $0xa8] sm:$0xff] %vm667_vm2, %v870_v14  ;;  %v528_v15 = vpop.f32.mrf.mxu0 }
  0xe1   : > { %v608_v16 = vpop.f32.mrf.mxu1  ;;  %672 = vst.msk [vmem:[%s1093_s29 + $0x20] sm:$0xff] %vm667_vm2, %v528_v15 }
  0xe2   : > { %688 = vst.msk [vmem:[%s1093_s29 + $0xa0] sm:$0xff] %vm667_vm2, %v608_v16  ;;  %v849_v17 = vpop.f32.mrf.mxu0 }
  0xe3   : > { %v873_v18 = vpop.f32.mrf.mxu1  ;;  %675 = vst.msk [vmem:[%s1093_s29 + $0x38] sm:$0xff] %vm667_vm2, %v849_v17 }
  0xe4   : > { %691 = vst.msk [vmem:[%s1093_s29 + $0xb8] sm:$0xff] %vm667_vm2, %v873_v18  ;;  %v538_v19 = vpop.f32.mrf.mxu0 }
  0xe5   : > { %v618_v20 = vpop.f32.mrf.mxu1  ;;  %674 = vst.msk [vmem:[%s1093_s29 + $0x30] sm:$0xff] %vm667_vm2, %v538_v19 }
  0xe6   : > { %690 = vst.msk [vmem:[%s1093_s29 + $0xb0] sm:$0xff] %vm667_vm2, %v618_v20  ;;  %v852_v21 = vpop.f32.mrf.mxu0 }
  0xe7   : > { %v876_v22 = vpop.f32.mrf.mxu1  ;;  %677 = vst.msk [vmem:[%s1093_s29 + $0x48] sm:$0xff] %vm667_vm2, %v852_v21 }
  0xe8   : > { %693 = vst.msk [vmem:[%s1093_s29 + $0xc8] sm:$0xff] %vm667_vm2, %v876_v22  ;;  %v548_v23 = vpop.f32.mrf.mxu0 }
  0xe9   : > { %v628_v24 = vpop.f32.mrf.mxu1  ;;  %676 = vst.msk [vmem:[%s1093_s29 + $0x40] sm:$0xff] %vm667_vm2, %v548_v23 }
  0xea   : > { %692 = vst.msk [vmem:[%s1093_s29 + $0xc0] sm:$0xff] %vm667_vm2, %v628_v24  ;;  %v855_v25 = vpop.f32.mrf.mxu0 }
  0xeb   : > { %v879_v26 = vpop.f32.mrf.mxu1  ;;  %679 = vst.msk [vmem:[%s1093_s29 + $0x58] sm:$0xff] %vm667_vm2, %v855_v25 }
  0xec   : > { %695 = vst.msk [vmem:[%s1093_s29 + $0xd8] sm:$0xff] %vm667_vm2, %v879_v26  ;;  %v558_v27 = vpop.f32.mrf.mxu0 }
  0xed   : > { %v638_v28 = vpop.f32.mrf.mxu1  ;;  %678 = vst.msk [vmem:[%s1093_s29 + $0x50] sm:$0xff] %vm667_vm2, %v558_v27 }
  0xee   : > { %694 = vst.msk [vmem:[%s1093_s29 + $0xd0] sm:$0xff] %vm667_vm2, %v638_v28  ;;  %v858_v29 = vpop.f32.mrf.mxu0 }
  0xef   : > { %v882_v30 = vpop.f32.mrf.mxu1  ;;  %681 = vst.msk [vmem:[%s1093_s29 + $0x68] sm:$0xff] %vm667_vm2, %v858_v29 }
  0xf0   : > { %697 = vst.msk [vmem:[%s1093_s29 + $0xe8] sm:$0xff] %vm667_vm2, %v882_v30  ;;  %v568_v31 = vpop.f32.mrf.mxu0 }
  0xf1   : > { %v648_v32 = vpop.f32.mrf.mxu1  ;;  %680 = vst.msk [vmem:[%s1093_s29 + $0x60] sm:$0xff] %vm667_vm2, %v568_v31 }
  0xf2   : > { %696 = vst.msk [vmem:[%s1093_s29 + $0xe0] sm:$0xff] %vm667_vm2, %v648_v32  ;;  %v861_v33 = vpop.f32.mrf.mxu0 }
  0xf3   : > { %v885_v34 = vpop.f32.mrf.mxu1  ;;  %683 = vst.msk [vmem:[%s1093_s29 + $0x78] sm:$0xff] %vm667_vm2, %v861_v33 }
  0xf4   : > { %699 = vst.msk [vmem:[%s1093_s29 + $0xf8] sm:$0xff] %vm667_vm2, %v885_v34  ;;  %v578_v35 = vpop.f32.mrf.mxu0 }
  0xf5   : > { %v658_v36 = vpop.f32.mrf.mxu1  ;;  %682 = vst.msk [vmem:[%s1093_s29 + $0x70] sm:$0xff] %vm667_vm2, %v578_v35 }
  0xf6   : > { %698 = vst.msk [vmem:[%s1093_s29 + $0xf0] sm:$0xff] %vm667_vm2, %v658_v36 }
  0xf7 PF: > { %s14_s15 = sadd.s32 1, %s902_s15  }
  0xf8   : > { %p11_p4 = scmp.ge.s32.totalorder %s14_s15, 4  }
  0xfa   :  { %13 = sbr.rel (!%p11_p4) target bundleno = 1 (0x1), region = 66 }

</bundles_post_ra>
